<compile_context>
chip_gen: v7x
topology: tpu7x:2x2x1
jax: 0.10.0
libtpu: 0.0.40
codegen_flags: <defaults>
</compile_context>

<pallas_src>
import functools

import jax
import jax.numpy as jnp
from jax.experimental import pallas as pl
from jax.experimental.pallas import tpu as pltpu


def head_kernel(q_ref, k_ref, v_ref,
                wq_ref, bq_ref, wk_ref, bk_ref, wv_ref, bv_ref,
                o_ref, *, compute_dtype):
    # q_ref/k_ref/v_ref: (Bt, T, C) activation blocks.
    # w*_ref: (C, H) pre-transposed weights (wq already folded with 1/sqrt(H)).
    # b*_ref: (1, H) f32 biases (bq already folded with 1/sqrt(H)).
    Bt, T, C = q_ref.shape

    def project(x_ref, w_ref, b_ref):
        # Flatten batch into the GEMM M dimension: (Bt*T, C) @ (C, H).
        x2 = x_ref[...].reshape(Bt * T, C)
        y = jax.lax.dot_general(
            x2, w_ref[...],
            (((1,), (0,)), ((), ())),
            preferred_element_type=jnp.float32)
        y = y + b_ref[...]                        # f32 bias add (broadcast over rows)
        return y.reshape(Bt, T, -1)

    q = project(q_ref, wq_ref, bq_ref)            # (Bt, T, H), f32 (scale folded in)
    k = project(k_ref, wk_ref, bk_ref)            # (Bt, T, H), f32
    v = project(v_ref, wv_ref, bv_ref)            # (Bt, T, H), f32

    # Scores: batched contraction over H, K never transposed.
    scores = jax.lax.dot_general(
        q.astype(compute_dtype), k.astype(compute_dtype),
        (((2,), (2,)), ((0,), (0,))),
        preferred_element_type=jnp.float32)       # (Bt, T, T), f32

    # Numerically-stable softmax over the last axis (kept in f32).
    m = jnp.max(scores, axis=-1, keepdims=True)
    e = jnp.exp(scores - m)
    denom = jnp.sum(e, axis=-1, keepdims=True)
    use_approx = compute_dtype != jnp.float32
    p_attn = e * pl.reciprocal(denom, approx=use_approx)

    # Dropout is identity at inference time.

    # Attention output: batched (Bt, T, T) @ (Bt, T, H) -> (Bt, T, H).
    attn = jax.lax.dot_general(
        p_attn.astype(compute_dtype), v.astype(compute_dtype),
        (((2,), (1,)), ((0,), (0,))),
        preferred_element_type=jnp.float32)
    o_ref[...] = attn.astype(o_ref.dtype)


def _pick_block_b(B, T, C, H, itemsize, vmem_budget_bytes=24 * 1024 * 1024):
    """Largest divisor of B with block_b*T near 256 rows and fitting VMEM."""
    target_rows = 256
    best = 1
    for d in range(1, B + 1):
        if B % d != 0:
            continue
        # Rough per-step VMEM: 3 activation blocks + output block, double-buffered,
        # plus f32 intermediates (q/k/v projections, scores).
        acts = 2 * (3 * d * T * C + d * T * H) * itemsize
        interm = (3 * d * T * H + 2 * d * T * T) * 4
        if d * T <= target_rows and acts + interm <= vmem_budget_bytes:
            best = d
    return best


def head_forward(query, key, value, wq, bq, wk, bk, wv, bv,
                 *, block_b=None, compute_dtype=jnp.bfloat16):
    """query/key/value: (B, T, C); w*: (H, C); b*: (H,). Returns (B, T, H)."""
    B, T, C = query.shape
    H = wq.shape[0]

    # Fold the 1/sqrt(head_size) attention scale into the query projection,
    # and pre-transpose all weights to (C, H) so the kernel does x @ W.
    scale = jnp.float32(H) ** -0.5
    wq_t = (wq.T.astype(jnp.float32) * scale).astype(compute_dtype)   # (C, H)
    wk_t = wk.T.astype(compute_dtype)                                 # (C, H)
    wv_t = wv.T.astype(compute_dtype)                                 # (C, H)
    bq2 = (bq.astype(jnp.float32) * scale).reshape(1, H)              # f32
    bk2 = bk.astype(jnp.float32).reshape(1, H)
    bv2 = bv.astype(jnp.float32).reshape(1, H)

    qx = query.astype(compute_dtype)
    kx = key.astype(compute_dtype)
    vx = value.astype(compute_dtype)

    itemsize = jnp.dtype(compute_dtype).itemsize
    if block_b is None:
        block_b = _pick_block_b(B, T, C, H, itemsize)
    assert B % block_b == 0
    n_blocks = B // block_b

    act_spec = pl.BlockSpec((block_b, T, C), lambda b: (b, 0, 0))
    w_spec = pl.BlockSpec((C, H), lambda b: (0, 0))
    b_spec = pl.BlockSpec((1, H), lambda b: (0, 0))
    out_spec = pl.BlockSpec((block_b, T, H), lambda b: (b, 0, 0))

    cost = pl.CostEstimate(
        flops=int(2 * B * T * C * H * 3 + 2 * B * T * T * H * 2),
        transcendentals=int(B * T * T),
        bytes_accessed=int(3 * B * T * C * itemsize          # q/k/v activations
                           + 3 * C * H * itemsize            # weights
                           + 3 * H * 4                       # biases
                           + B * T * H * query.dtype.itemsize))  # output

    kernel = functools.partial(head_kernel, compute_dtype=compute_dtype)

    return pl.pallas_call(
        kernel,
        out_shape=jax.ShapeDtypeStruct((B, T, H), query.dtype),
        grid_spec=pltpu.PrefetchScalarGridSpec(
            num_scalar_prefetch=0,
            grid=(n_blocks,),
            in_specs=[act_spec, act_spec, act_spec,
                      w_spec, b_spec, w_spec, b_spec, w_spec, b_spec],
            out_specs=out_spec,
        ),
        compiler_params=pltpu.CompilerParams(
            dimension_semantics=("parallel",)),
        cost_estimate=cost,
    )(qx, kx, vx, wq_t, bq2, wk_t, bk2, wv_t, bv2)


def reference_head(query, key, value, wq, bq, wk, bk, wv, bv):
    q = query @ wq.T + bq
    k = key @ wk.T + bk
    v = value @ wv.T + bv
    scores = jnp.einsum("btd,bsd->bts", q, k) * (wq.shape[0] ** -0.5)
    p = jax.nn.softmax(scores, axis=-1)
    return jnp.einsum("bts,bsd->btd", p, v)


if __name__ == "__main__":
    B, T, C, H = 2, 8, 32, 16  # batch, seq_len, embed_dim, head_size

    root = jax.random.PRNGKey(0)
    keys = jax.random.split(root, 9)

    # Deterministic PyTorch-Linear-style init: U(-1/sqrt(fan_in), 1/sqrt(fan_in))
    bound = 1.0 / (C ** 0.5)
    wq = jax.random.uniform(keys[0], (H, C), jnp.float32, -bound, bound)
    bq = jax.random.uniform(keys[1], (H,), jnp.float32, -bound, bound)
    wk = jax.random.uniform(keys[2], (H, C), jnp.float32, -bound, bound)
    bk = jax.random.uniform(keys[3], (H,), jnp.float32, -bound, bound)
    wv = jax.random.uniform(keys[4], (H, C), jnp.float32, -bound, bound)
    bv = jax.random.uniform(keys[5], (H,), jnp.float32, -bound, bound)

    query = jax.random.normal(keys[6], (B, T, C), jnp.float32)
    key = jax.random.normal(keys[7], (B, T, C), jnp.float32)
    value = jax.random.normal(keys[8], (B, T, C), jnp.float32)

    ref = reference_head(query, key, value, wq, bq, wk, bk, wv, bv)

    # Exact-precision path (f32 matmuls, exact reciprocal): tight tolerance.
    out_f32 = head_forward(query, key, value, wq, bq, wk, bk, wv, bv,
                           compute_dtype=jnp.float32)
    out_f32 = jax.block_until_ready(out_f32)
    assert out_f32.shape == (B, T, H)
    assert jnp.allclose(out_f32, ref, atol=1e-4, rtol=1e-4)

    # Performance path (bf16 MXU inputs, f32 accumulation): relaxed tolerance.
    out_bf16 = head_forward(query, key, value, wq, bq, wk, bk, wv, bv)
    out_bf16 = jax.block_until_ready(out_bf16)
    assert out_bf16.shape == (B, T, H)
    assert jnp.allclose(out_bf16, ref, atol=2e-2, rtol=2e-2)

    print("KERNEL_OK")
</pallas_src>

<mosaic_0001>
module attributes {stable_mosaic.version = 11 : i64} {
  func.func @head_kernel(%arg0: i32, %arg1: memref<2x8x32xf32, #tpu.memory_space<vmem>>, %arg2: memref<2x8x32xf32, #tpu.memory_space<vmem>>, %arg3: memref<2x8x32xf32, #tpu.memory_space<vmem>>, %arg4: memref<32x16xf32, #tpu.memory_space<vmem>>, %arg5: memref<1x16xf32, #tpu.memory_space<vmem>>, %arg6: memref<32x16xf32, #tpu.memory_space<vmem>>, %arg7: memref<1x16xf32, #tpu.memory_space<vmem>>, %arg8: memref<32x16xf32, #tpu.memory_space<vmem>>, %arg9: memref<1x16xf32, #tpu.memory_space<vmem>>, %arg10: memref<2x8x16xf32, #tpu.memory_space<vmem>>) attributes {dimension_semantics = [#tpu.dimension_semantics<parallel>], iteration_bounds = array<i64: 1>, scalar_prefetch = 0 : i64, scratch_operands = 0 : i64, tpu.core_type = #tpu.core_type<tc>, window_params = [{transform_indices = @transform_0, window_bounds = array<i64: 2, 8, 32>}, {transform_indices = @transform_1, window_bounds = array<i64: 2, 8, 32>}, {transform_indices = @transform_2, window_bounds = array<i64: 2, 8, 32>}, {pipeline_mode = #tpu.pipeline_mode<synchronous>, transform_indices = @transform_3, window_bounds = array<i64: 32, 16>}, {pipeline_mode = #tpu.pipeline_mode<synchronous>, transform_indices = @transform_4, window_bounds = array<i64: 1, 16>}, {pipeline_mode = #tpu.pipeline_mode<synchronous>, transform_indices = @transform_5, window_bounds = array<i64: 32, 16>}, {pipeline_mode = #tpu.pipeline_mode<synchronous>, transform_indices = @transform_6, window_bounds = array<i64: 1, 16>}, {pipeline_mode = #tpu.pipeline_mode<synchronous>, transform_indices = @transform_7, window_bounds = array<i64: 32, 16>}, {pipeline_mode = #tpu.pipeline_mode<synchronous>, transform_indices = @transform_8, window_bounds = array<i64: 1, 16>}, {transform_indices = @transform_9, window_bounds = array<i64: 2, 8, 16>}]} {
    %c0 = arith.constant 0 : index
    %c0_0 = arith.constant 0 : index
    %c0_1 = arith.constant 0 : index
    %0 = vector.load %arg1[%c0, %c0_0, %c0_1] : memref<2x8x32xf32, #tpu.memory_space<vmem>>, vector<2x8x32xf32>
    %1 = vector.shape_cast %0 : vector<2x8x32xf32> to vector<16x32xf32>
    %c0_2 = arith.constant 0 : index
    %c0_3 = arith.constant 0 : index
    %2 = vector.load %arg4[%c0_2, %c0_3] : memref<32x16xf32, #tpu.memory_space<vmem>>, vector<32x16xf32>
    %cst = arith.constant dense<0.000000e+00> : vector<16x16xf32>
    %3 = tpu.matmul %1, %2, %cst {dimension_numbers = #tpu.dot_dimension_numbers<[1], [0], [0], [1], [0, 0, 1, 1], [], []>} : vector<16x32xf32>, vector<32x16xf32>, vector<16x16xf32> -> vector<16x16xf32>
    %c0_4 = arith.constant 0 : index
    %c0_5 = arith.constant 0 : index
    %4 = vector.load %arg5[%c0_4, %c0_5] : memref<1x16xf32, #tpu.memory_space<vmem>>, vector<1x16xf32>
    %5 = vector.broadcast %4 : vector<1x16xf32> to vector<16x16xf32>
    %6 = arith.addf %3, %5 : vector<16x16xf32>
    %7 = vector.shape_cast %6 : vector<16x16xf32> to vector<2x8x16xf32>
    %c0_6 = arith.constant 0 : index
    %c0_7 = arith.constant 0 : index
    %c0_8 = arith.constant 0 : index
    %8 = vector.load %arg2[%c0_6, %c0_7, %c0_8] : memref<2x8x32xf32, #tpu.memory_space<vmem>>, vector<2x8x32xf32>
    %9 = vector.shape_cast %8 : vector<2x8x32xf32> to vector<16x32xf32>
    %c0_9 = arith.constant 0 : index
    %c0_10 = arith.constant 0 : index
    %10 = vector.load %arg6[%c0_9, %c0_10] : memref<32x16xf32, #tpu.memory_space<vmem>>, vector<32x16xf32>
    %cst_11 = arith.constant dense<0.000000e+00> : vector<16x16xf32>
    %11 = tpu.matmul %9, %10, %cst_11 {dimension_numbers = #tpu.dot_dimension_numbers<[1], [0], [0], [1], [0, 0, 1, 1], [], []>} : vector<16x32xf32>, vector<32x16xf32>, vector<16x16xf32> -> vector<16x16xf32>
    %c0_12 = arith.constant 0 : index
    %c0_13 = arith.constant 0 : index
    %12 = vector.load %arg7[%c0_12, %c0_13] : memref<1x16xf32, #tpu.memory_space<vmem>>, vector<1x16xf32>
    %13 = vector.broadcast %12 : vector<1x16xf32> to vector<16x16xf32>
    %14 = arith.addf %11, %13 : vector<16x16xf32>
    %15 = vector.shape_cast %14 : vector<16x16xf32> to vector<2x8x16xf32>
    %c0_14 = arith.constant 0 : index
    %c0_15 = arith.constant 0 : index
    %c0_16 = arith.constant 0 : index
    %16 = vector.load %arg3[%c0_14, %c0_15, %c0_16] : memref<2x8x32xf32, #tpu.memory_space<vmem>>, vector<2x8x32xf32>
    %17 = vector.shape_cast %16 : vector<2x8x32xf32> to vector<16x32xf32>
    %c0_17 = arith.constant 0 : index
    %c0_18 = arith.constant 0 : index
    %18 = vector.load %arg8[%c0_17, %c0_18] : memref<32x16xf32, #tpu.memory_space<vmem>>, vector<32x16xf32>
    %cst_19 = arith.constant dense<0.000000e+00> : vector<16x16xf32>
    %19 = tpu.matmul %17, %18, %cst_19 {dimension_numbers = #tpu.dot_dimension_numbers<[1], [0], [0], [1], [0, 0, 1, 1], [], []>} : vector<16x32xf32>, vector<32x16xf32>, vector<16x16xf32> -> vector<16x16xf32>
    %c0_20 = arith.constant 0 : index
    %c0_21 = arith.constant 0 : index
    %20 = vector.load %arg9[%c0_20, %c0_21] : memref<1x16xf32, #tpu.memory_space<vmem>>, vector<1x16xf32>
    %21 = vector.broadcast %20 : vector<1x16xf32> to vector<16x16xf32>
    %22 = arith.addf %19, %21 : vector<16x16xf32>
    %23 = vector.shape_cast %22 : vector<16x16xf32> to vector<2x8x16xf32>
    %cst_22 = arith.constant dense<0.000000e+00> : vector<2x8x8xf32>
    %24 = tpu.matmul %7, %15, %cst_22 {dimension_numbers = #tpu.dot_dimension_numbers<[2], [2], [1], [1], [0, 0, 0, 1, 1, 1], [0], [0]>} : vector<2x8x16xf32>, vector<2x8x16xf32>, vector<2x8x8xf32> -> vector<2x8x8xf32>
    %cst_23 = arith.constant dense<0xFF800000> : vector<2x8xf32>
    %25 = vector.multi_reduction <maximumf>, %24, %cst_23 [2] : vector<2x8x8xf32> to vector<2x8xf32>
    %26 = vector.shape_cast %25 : vector<2x8xf32> to vector<2x8x1xf32>
    %27 = vector.broadcast %26 : vector<2x8x1xf32> to vector<2x8x8xf32>
    %28 = arith.subf %24, %27 : vector<2x8x8xf32>
    %29 = math.exp %28 : vector<2x8x8xf32>
    %cst_24 = arith.constant dense<0.000000e+00> : vector<2x8xf32>
    %30 = vector.multi_reduction <add>, %29, %cst_24 [2] : vector<2x8x8xf32> to vector<2x8xf32>
    %31 = vector.shape_cast %30 : vector<2x8xf32> to vector<2x8x1xf32>
    %32 = tpu.reciprocal %31 : vector<2x8x1xf32> -> vector<2x8x1xf32>
    %33 = vector.broadcast %32 : vector<2x8x1xf32> to vector<2x8x8xf32>
    %34 = arith.mulf %29, %33 : vector<2x8x8xf32>
    %cst_25 = arith.constant dense<0.000000e+00> : vector<2x8x16xf32>
    %35 = tpu.matmul %34, %23, %cst_25 {dimension_numbers = #tpu.dot_dimension_numbers<[2], [1], [1], [2], [0, 0, 0, 1, 1, 2], [0], [0]>} : vector<2x8x8xf32>, vector<2x8x16xf32>, vector<2x8x16xf32> -> vector<2x8x16xf32>
    %c0_26 = arith.constant 0 : index
    %c0_27 = arith.constant 0 : index
    %c0_28 = arith.constant 0 : index
    %36 = vector.load %arg10[%c0_26, %c0_27, %c0_28] : memref<2x8x16xf32, #tpu.memory_space<vmem>>, vector<2x8x16xf32>
    tpu.vector_store %arg10[%c0_26, %c0_27, %c0_28], %35 {strides = array<i32>} : memref<2x8x16xf32, #tpu.memory_space<vmem>>, vector<2x8x16xf32>,
    return
  }
  func.func @transform_0(%arg0: i32) -> (i32, i32, i32) {
    %c0_i32 = arith.constant 0 : i32
    %c0_i32_0 = arith.constant 0 : i32
    %c0_i32_1 = arith.constant 0 : i32
    return %arg0, %c0_i32, %c0_i32_0 : i32, i32, i32
  }
  func.func @transform_1(%arg0: i32) -> (i32, i32, i32) {
    %c0_i32 = arith.constant 0 : i32
    %c0_i32_0 = arith.constant 0 : i32
    %c0_i32_1 = arith.constant 0 : i32
    return %arg0, %c0_i32, %c0_i32_0 : i32, i32, i32
  }
  func.func @transform_2(%arg0: i32) -> (i32, i32, i32) {
    %c0_i32 = arith.constant 0 : i32
    %c0_i32_0 = arith.constant 0 : i32
    %c0_i32_1 = arith.constant 0 : i32
    return %arg0, %c0_i32, %c0_i32_0 : i32, i32, i32
  }
  func.func @transform_3(%arg0: i32) -> (i32, i32) {
    %c0_i32 = arith.constant 0 : i32
    %c0_i32_0 = arith.constant 0 : i32
    %c0_i32_1 = arith.constant 0 : i32
    return %c0_i32, %c0_i32_0 : i32, i32
  }
  func.func @transform_4(%arg0: i32) -> (i32, i32) {
    %c0_i32 = arith.constant 0 : i32
    %c0_i32_0 = arith.constant 0 : i32
    %c0_i32_1 = arith.constant 0 : i32
    return %c0_i32, %c0_i32_0 : i32, i32
  }
  func.func @transform_5(%arg0: i32) -> (i32, i32) {
    %c0_i32 = arith.constant 0 : i32
    %c0_i32_0 = arith.constant 0 : i32
    %c0_i32_1 = arith.constant 0 : i32
    return %c0_i32, %c0_i32_0 : i32, i32
  }
  func.func @transform_6(%arg0: i32) -> (i32, i32) {
    %c0_i32 = arith.constant 0 : i32
    %c0_i32_0 = arith.constant 0 : i32
    %c0_i32_1 = arith.constant 0 : i32
    return %c0_i32, %c0_i32_0 : i32, i32
  }
  func.func @transform_7(%arg0: i32) -> (i32, i32) {
    %c0_i32 = arith.constant 0 : i32
    %c0_i32_0 = arith.constant 0 : i32
    %c0_i32_1 = arith.constant 0 : i32
    return %c0_i32, %c0_i32_0 : i32, i32
  }
  func.func @transform_8(%arg0: i32) -> (i32, i32) {
    %c0_i32 = arith.constant 0 : i32
    %c0_i32_0 = arith.constant 0 : i32
    %c0_i32_1 = arith.constant 0 : i32
    return %c0_i32, %c0_i32_0 : i32, i32
  }
  func.func @transform_9(%arg0: i32) -> (i32, i32, i32) {
    %c0_i32 = arith.constant 0 : i32
    %c0_i32_0 = arith.constant 0 : i32
    %c0_i32_1 = arith.constant 0 : i32
    return %arg0, %c0_i32, %c0_i32_0 : i32, i32, i32
  }
}

</mosaic_0001>

<bundles_post_ra>
// kernel: tpu_custom_call.1
= control target key start
LH: loop header
LB: loop body
LE: loop exit
PB: predicated region body
PF: predicated region fallthrough
CT: control target
= control target key end

     0   :  { %vm46_vm0 = vcmask 261120   ;;  %s963_s0 = inlined_call_operand.vmem [shape: f32[2,8,32], index: 0, kind: input, shape index: {}]   ;;  %s964_s1 = inlined_call_operand.vmem [shape: f32[2,8,32], index: 1, kind: input, shape index: {}]   ;;  %s965_s2 = inlined_call_operand.vmem [shape: f32[2,8,32], index: 2, kind: input, shape index: {}]   ;;  %s966_s3 = inlined_call_operand.vmem [shape: f32[32,16], index: 3, kind: input, shape index: {}]   ;;  %s967_s4 = inlined_call_operand.vmem [shape: f32[1,16], index: 4, kind: input, shape index: {}]   ;;  %s968_s5 = inlined_call_operand.vmem [shape: f32[32,16], index: 5, kind: input, shape index: {}]   ;;  %s969_s6 = inlined_call_operand.vmem [shape: f32[1,16], index: 6, kind: input, shape index: {}]   ;;  %s970_s7 = inlined_call_operand.vmem [shape: f32[32,16], index: 7, kind: input, shape index: {}]   ;;  %s971_s8 = inlined_call_operand.vmem [shape: f32[1,16], index: 8, kind: input, shape index: {}]   ;;  %s972_s9 = inlined_call_operand.hbm [shape: f32[2,8,16], index: 9, kind: output, shape index: {}]  }
   0x1   :  { %v130_v0 = vld [vmem:[%s968_s5] sm:$0xff]  ;;  %v131_v1 = vld [vmem:[%s968_s5 + $0x8] sm:$0xff]  ;;  %v132_v5 = vld [vmem:[%s968_s5 + $0x10] sm:$0xff] }
   0x2   :  { %v35_v2 = vld [vmem:[%s966_s3] sm:$0xff]  ;;  %v758_v3 = vpack.c.bf16 %v131_v1, %v130_v0  ;;  %v36_v4 = vld [vmem:[%s966_s3 + $0x8] sm:$0xff]  ;;  %v133_v6 = vld [vmem:[%s968_s5 + $0x18] sm:$0xff] }
   0x3   :  { %v750_v7 = vpack.c.bf16 %v36_v4, %v35_v2  ;;  %v762_v8 = vpack.c.bf16 %v133_v6, %v132_v5  ;;  %v37_v9 = vld [vmem:[%s966_s3 + $0x10] sm:$0xff]  ;;  %v38_v10 = vld [vmem:[%s966_s3 + $0x18] sm:$0xff]  ;;  %v128_v11 = vld [vmem:[%s964_s1] sm:$0xff] }
   0x4   :  { %759 = vmatprep.subr.bf16.mxu1 %v758_v3  ;;  %v754_v12 = vpack.c.bf16 %v38_v10, %v37_v9  ;;  %716 = vmatprep.mubr.msk.f32.mxu1 %vm46_vm0, %v128_v11  ;;  %v33_v13 = vld [vmem:[%s963_s0] sm:$0xff] }
   0x5   :  { %761 = vmatpush3.bf16.msra.mxu1 %v758_v3  ;;  %751 = vmatprep.subr.bf16.mxu0 %v750_v7 }
   0x6   :  { %14 = vsyncpa [#allocation3], 0  ;;  %753 = vmatpush3.bf16.msra.mxu0 %v750_v7  ;;  %763 = vmatprep.subr.bf16.mxu1 %v762_v8  ;;  %v129_v14 = vld [vmem:[%s964_s1 + $0x8] sm:$0xff]  ;;  %v811_v16 = vmov 0.0   ;;  %vm812_vm1 = vmmov 0   ;;  %vm316_vm2 = vcmask 130048  }
   0x7   :  { %755 = vmatprep.subr.bf16.mxu0 %v754_v12  ;;  %705 = vmatprep.mubr.msk.f32.mxu0 %vm46_vm0, %v33_v13  ;;  %v34_v15 = vld [vmem:[%s963_s0 + $0x8] sm:$0xff]  ;;  %v659_v17 = vld [vmem:[%s969_s6] ss:$0 sm:$0xff]  ;;  %v226_v29 = vld [vmem:[%s970_s7 + $0x10] sm:$0xff]  ;;  %vm469_vm3 = vcmask 64512   ;;  %s813_s22 = smov [#allocation2]  }
   0x8   :  { %v656_v19 = vld [vmem:[%s967_s4] ss:$0 sm:$0xff]  ;;  %v225_v28 = vld [vmem:[%s970_s7 + $0x8] sm:$0xff]  ;;  %v227_v31 = vld [vmem:[%s970_s7 + $0x18] sm:$0xff]  ;;  %s645_s23 = sshll.u32 %s813_s22, 4  ;;  %s646_s23 = int_to_ptr.vmem [resolvable:$true] %s645_s23 }
   0x9   :  { %765 = vmatpush3.bf16.msra.mxu1 %v762_v8  ;;  %v224_v27 = vld [vmem:[%s970_s7] sm:$0xff]  ;;  %v770_v33 = vpack.c.bf16 %v227_v31, %v226_v29  ;;  %v223_v34 = vld [vmem:[%s965_s2 + $0x8] sm:$0xff]  ;;  %p792_p1 = scmp.lt.s32.totalorder %s646_s23, %s646_s23 }
   0xa   :  { %757 = vmatpush3.bf16.msra.mxu0 %v754_v12  ;;  %730 = vmatprep.subr.mxu1 %v811_v16  ;;  %v766_v30 = vpack.c.bf16 %v225_v28, %v224_v27  ;;  %v222_v32 = vld [vmem:[%s965_s2] sm:$0xff] }
   0xb   :  { %v662_v52 = vld [vmem:[%s971_s8] ss:$0 sm:$0xff]  ;;  %s787_s8 = scalar_lea.vmem %s646_s23, 256 }
   0xc   :  { %717 = vmatmul.mubr.msk.f32.vlgmr.msra.gmra.mrb[0].mxu1 %vm46_vm0, %v129_v14  ;;  %767 = vmatprep.subr.bf16.mxu0 %v766_v30  ;;  %p788_p0 = scmp.ne.s32.totalorder %s646_s23, %s787_s8  ;;  %p793_p2 = scmp.lt.s32.totalorder %s787_s8, %s787_s8 }
   0xd   :  { %706 = vmatmul.mubr.msk.f32.vlgmr.msra.gmra.mrb[0].mxu0 %vm46_vm0, %v34_v15  ;;  %732 = vmatprep.mubr.msk.f32.mxu1 %vm812_vm1, %v811_v16 }
   0xe   :  { %727 = vmatprep.mubr.msk.f32.mxu0 %vm46_vm0, %v222_v32  ;;  %769 = vmatpush3.bf16.msra.mxu0 %v766_v30  ;;  %p794_p3 = por %p793_p2, %p792_p1 }
   0xf   :  { %771 = vmatprep.subr.bf16.mxu0 %v770_v33 }
  0x10   :  { %p795_p4 = pnand %p794_p3, %p788_p0 }
  0x12   :  { %773 = vmatpush3.bf16.msra.mxu0 %v770_v33 }
  0x13   :  { %740 = vmatprep.subr.mxu0 %v811_v16 }
  0x15   :  { %728 = vmatmul.mubr.msk.f32.vlgmr.msra.gmra.mrb[2].mxu0 %vm46_vm0, %v223_v34 }
  0x16   :  { %742 = vmatprep.mubr.msk.f32.mxu0 %vm812_vm1, %v811_v16 }
  0xdf   :  { %v718_v18 = vpop.f32.mrb[0].mxu1 }
  0xe0   :  { %v213_v20 = vpop.f32.mrb[1].mxu1  ;;  %v707_v21 = vpop.f32.mrb[0].mxu0  ;;  %v219_v25 = vadd.f32 %v718_v18, %v659_v17 }
  0xe1   :  { %v214_v22 = vadd.f32 %v659_v17, %v213_v20  ;;  %v119_v23 = vpop.f32.mrb[1].mxu0  ;;  %v125_v26 = vadd.f32 %v707_v21, %v656_v19 }
  0xe2   :  { %v120_v24 = vadd.f32 %v656_v19, %v119_v23 }
  0xe3   :  { %731 = vmatpush3.xpose.msk.msra.mxu1 %vm316_vm2, %v214_v22 }
  0xe4   :  { %735 = vmatprep.subr.mxu1 %v811_v16 }
  0xe6   :  { %733 = vmatmul.mubr.msk.f32.vlgmr.msra.gmra.mrb[2].mxu1 %vm316_vm2, %v120_v24 }
  0xe7   :  { %736 = vmatpush3.xpose.msk.msra.mxu1 %vm316_vm2, %v219_v25  ;;  %737 = vmatprep.mubr.msk.f32.mxu1 %vm812_vm1, %v811_v16 }
  0xe8   :  { %745 = vmatprep.subr.mxu1 %v811_v16  ;;  %v729_v51 = vpop.f32.mrb[2].mxu0 }
  0xe9   :  { %v307_v53 = vpop.f32.mrb[3].mxu0  ;;  %v313_v55 = vadd.f32 %v729_v51, %v662_v52 }
  0xea   :  { %738 = vmatmul.mubr.msk.f32.vlgmr.msra.gmra.mrb[4].mxu1 %vm316_vm2, %v125_v26  ;;  %v308_v54 = vadd.f32 %v662_v52, %v307_v53 }
  0xeb   :  { %747 = vmatprep.mubr.msk.f32.mxu1 %vm812_vm1, %v811_v16  ;;  %746 = vmatpush3.msra.mxu1 %v313_v55 }
  0xec   :  { %741 = vmatpush3.msra.mxu0 %v308_v54 }
 0x1b9   :  { %v389_v35 = vpop.f32.mrb[2].mxu1 }
 0x1ba   :  { %v734_v36 = vpop.f32.mrb[3].mxu1  ;;  %v470_v37 = vsel %vm469_vm3, %v389_v35, -inf }
 0x1bb   :  { %471 = vmax.xlane.f32.xlu0 %v470_v37 }
 0x1bd   :  { %v465_v38 = vpop.f32.mrb[4].mxu1 }
 0x1be   :  { %v739_v39 = vpop.f32.mrb[5].mxu1  ;;  %v473_v40 = vsel %vm469_vm3, %v465_v38, -inf }
 0x1bf   :  { %474 = vmax.xlane.f32.xlu0 %v473_v40 }
 0x248   :  { %v472_v41 = vpop.xlane.xlu0 %471 }
 0x249   :  { %v476_v42 = vsub.f32 %v389_v35, %v472_v41 }
 0x24b   :  { %v478_v43 = vmul.f32 1.442695, %v476_v42 }
 0x24c   :  { %v475_v44 = vpop.xlane.xlu0 %474 }
 0x24d   :  { %779 = vpow2.f32 %v478_v43  ;;  %v477_v45 = vsub.f32 %v465_v38, %v475_v44 }
 0x24f   :  { %v480_v46 = vmul.f32 1.442695, %v477_v45 }
 0x251   :  { %781 = vpow2.f32 %v480_v46 }
 0x257   :  { %v780_v47 = vpop.eup %779 }
 0x258   :  { %v482_v48 = vsel %vm469_vm3, %v780_v47, 0.0 }
 0x259   :  { %483 = vadd.xlane.f32.xlu1 %v482_v48 }
 0x25b   :  { %v782_v49 = vpop.eup %781 }
 0x25c   :  { %v485_v50 = vsel %vm469_vm3, %v782_v49, 0.0 }
 0x25d   :  { %486 = vadd.xlane.f32.xlu1 %v485_v50 }
 0x2e6   :  { %v484_v56 = vpop.xlane.xlu1 %483 }
 0x2e7   :  { %783 = vrcp.f32 %v484_v56 }
 0x2ea   :  { %v487_v57 = vpop.xlane.xlu1 %486 }
 0x2eb   :  { %785 = vrcp.f32 %v487_v57 }
 0x2f1   :  { %v784_v58 = vpop.eup %783 }
 0x2f2   :  { %v490_v59 = vmul.f32 %v784_v58, %v780_v47 }
 0x2f4   :  { %743 = vmatmul.mubr.msk.f32.vlgmr.msra.gmra.mrb[4].mxu0 %vm469_vm3, %v490_v59 }
 0x2f5   :  { %v786_v60 = vpop.eup %785 }
 0x2f6   :  { %v491_v61 = vmul.f32 %v786_v60, %v782_v49 }
 0x2f8   :  { %748 = vmatmul.mubr.msk.f32.vlgmr.msra.gmra.mrb[6].mxu1 %vm469_vm3, %v491_v61 }
 0x3c7   :  { %v561_v62 = vpop.f32.mrb[4].mxu0 }
 0x3c8   :  { %638 = vst.msk [vmem:[#allocation2] sm:$0xff] %vm316_vm2, %v561_v62  ;;  %v744_v63 = vpop.f32.mrb[5].mxu0 }
 0x3cb   :  { %v634_v0 = vpop.f32.mrb[6].mxu1 }
 0x3cc   :  { %639 = vst.msk [vmem:[#allocation2 + $0x8] sm:$0xff] %vm316_vm2, %v634_v0  ;;  %v749_v1 = vpop.f32.mrb[7].mxu1 }
 0x3cd   :  { %798 = shalt.err (!%p795_p4)
}
 0x3ce   :  { %s799_s26 = scalar_lea.hbm %s972_s9, 256 }
 0x3cf   :  { %p800_p5 = scmp.ne.s32.totalorder %s972_s9, %s799_s26  ;;  %p803_p6 = scmp.lt.u32.totalorder %s799_s26, %s972_s9 }
 0x3d1   :  { %p805_p7 = pnand %p803_p6, %p800_p5 }
 0x3d3   :  { %808 = shalt.err (!%p805_p7)
}
 0x3d4   :  { %s814_s29 = smov 128   ;;  %s815_s30 = smov 8  }
 0x3d5   :  { %651 = dma.vmem_to_hbm [thread:$0]  %s646_s23, 256, %s972_s9, [#allocation3], %s814_s29, %s814_s29, %s815_s30  }
 0x3d6   :  { %809 = dma.done.wait [#allocation3], 256  }
 0x3d7   :  { %810 = vsyncadd [#allocation3], 4294967040 }
 0x3d8   :  { %655 = vsyncpa [#allocation3], 1 }

</bundles_post_ra>
